<compile_context>
chip_gen: v6e
topology: v6e:2x2x1
jax: 0.10.0
libtpu: 0.0.40
codegen_flags: <defaults>
</compile_context>

<pallas_src>
import jax
import jax.numpy as jnp
from jax import lax
from jax.experimental import pallas as pl
from jax.experimental.pallas import tpu as pltpu

K = 7               # depthwise conv kernel size
PAD = K // 2        # 'same' padding
LN_EPS = 1e-5
GRN_EPS = 1e-6
INV_SQRT2 = 0.7071067811865476


def convnext_kernel(x_ref, wdw_ref, bdw_ref, lng_ref, lnb_ref,
                    w2_ref, b2_ref, grng_ref, grnb_ref, w3_ref, b3_ref,
                    out_ref):
    # All arrays are (channels, time): channels on sublanes, time on lanes.
    x = x_ref[0].astype(jnp.float32)                      # (C, T) original input (= residual)
    C, T = x.shape
    wdw = wdw_ref[...].astype(jnp.float32)                # (C, K) depthwise taps

    # --- c1: depthwise conv1d, zero 'same' padding handled in-kernel ---------
    # Tap offset d = k - PAD reads x[:, t + d]; realized as a lane roll (XLU)
    # plus a boundary mask -- no padded copy of x is ever materialized.
    t_idx = lax.broadcasted_iota(jnp.int32, (C, T), 1)
    h = x * wdw[:, PAD:PAD + 1]                           # center tap (d = 0), no roll/mask
    for k in range(K):
        d = k - PAD
        if d == 0:
            continue
        shifted = pltpu.roll(x, shift=(-d) % T, axis=1)   # shifted[:, t] = x[:, (t + d) % T]
        mask = (t_idx >= -d) if d < 0 else (t_idx < T - d)
        h = h + jnp.where(mask, shifted, 0.0) * wdw[:, k:k + 1]
    h = h + bdw_ref[...]                                  # (C, 1) bias

    # --- LayerNorm over the channel dim (sublane reduction) ------------------
    mu = jnp.mean(h, axis=0, keepdims=True)               # (1, T)
    var = jnp.mean((h - mu) ** 2, axis=0, keepdims=True)  # (1, T)
    h = (h - mu) * lax.rsqrt(var + LN_EPS)
    h = h * lng_ref[...] + lnb_ref[...]                   # (C, 1) gamma / beta

    # --- c2: 1x1 conv C -> H as (H,C)@(C,T) matmul ----------------------------
    y = jnp.dot(w2_ref[...], h, preferred_element_type=jnp.float32) + b2_ref[...]

    # --- exact (erf) GELU, matches torch.nn.functional.gelu default -----------
    y = 0.5 * y * (1.0 + lax.erf(y * INV_SQRT2))

    # --- GRN: L2 norm over time (lane reduce), mean over channels -------------
    gx = jnp.sqrt(jnp.sum(y * y, axis=1, keepdims=True))              # (H, 1)
    nx = gx / (jnp.mean(gx, axis=0, keepdims=True) + GRN_EPS)         # (H, 1)
    y = grng_ref[...] * (y * nx) + grnb_ref[...] + y

    # --- c3: 1x1 conv H -> C, then residual add --------------------------------
    z = jnp.dot(w3_ref[...], y, preferred_element_type=jnp.float32) + b3_ref[...]
    out_ref[0] = (z + x).astype(out_ref.dtype)


def convnext_layer(x, params):
    """x: (B, C, T) float32 (PyTorch NCL layout). Returns (B, C, T)."""
    B, C, T = x.shape
    H = params["w2"].shape[0]

    # TODO(synk): for very long T on v7x (64 MiB VMEM), add a T-tiling grid axis with
    # halo'd input tiles and a two-pass GRN (accumulate sum(y^2) per channel across
    # tiles into VMEM scratch, then normalize); whole-T blocks are exact and tiny here.
    def const(shape):
        return pl.BlockSpec(shape, lambda b: (0,) * len(shape))

    return pl.pallas_call(
        convnext_kernel,
        out_shape=jax.ShapeDtypeStruct((B, C, T), x.dtype),
        grid=(B,),
        in_specs=[
            pl.BlockSpec((1, C, T), lambda b: (b, 0, 0)),   # x, one batch per grid step
            const((C, K)),  const((C, 1)),                  # depthwise weight / bias
            const((C, 1)),  const((C, 1)),                  # LayerNorm gamma / beta
            const((H, C)),  const((H, 1)),                  # c2 weight / bias
            const((H, 1)),  const((H, 1)),                  # GRN gamma / beta
            const((C, H)),  const((C, 1)),                  # c3 weight / bias
        ],
        out_specs=pl.BlockSpec((1, C, T), lambda b: (b, 0, 0)),   # lane-dense (T on lanes)
        compiler_params=pltpu.CompilerParams(
            dimension_semantics=("parallel",),              # batches are independent
            vmem_limit_bytes=32 * 1024 * 1024),
    )(x, params["wdw"], params["bdw"], params["lng"], params["lnb"],
      params["w2"], params["b2"], params["grng"], params["grnb"],
      params["w3"], params["b3"])


def reference(x, params):
    """Pure-JAX reference in NCL layout matching the PyTorch forward pass."""
    B, C, T = x.shape
    xp = jnp.pad(x, ((0, 0), (0, 0), (PAD, PAD)))
    h = sum(xp[:, :, k:k + T] * params["wdw"][None, :, k:k + 1] for k in range(K))
    h = h + params["bdw"][None]
    mu = h.mean(axis=1, keepdims=True)
    var = ((h - mu) ** 2).mean(axis=1, keepdims=True)
    h = (h - mu) / jnp.sqrt(var + LN_EPS) * params["lng"][None] + params["lnb"][None]
    y = jnp.einsum("hc,bct->bht", params["w2"], h) + params["b2"][None]
    y = 0.5 * y * (1.0 + lax.erf(y * INV_SQRT2))
    gx = jnp.sqrt(jnp.sum(y * y, axis=2, keepdims=True))
    nx = gx / (gx.mean(axis=1, keepdims=True) + GRN_EPS)
    y = params["grng"][None] * (y * nx) + params["grnb"][None] + y
    z = jnp.einsum("ch,bht->bct", params["w3"], y) + params["b3"][None]
    return z + x


if __name__ == "__main__":
    # Small shapes consistent with the module: channels=8, mlp_mul=2, kernel_size=7.
    # T = 256 (multiple of 128) so the time/lane dim is dense.
    B, C, T, MLP = 2, 8, 256, 2
    H = C * MLP

    key = jax.random.PRNGKey(0)
    ks = jax.random.split(key, 9)
    # Deterministic synthetic parameters in kernel-native (channel-major) layout.
    params = {
        "wdw":  jax.random.normal(ks[0], (C, K), jnp.float32) * 0.2,   # c1 depthwise weight (C, K)
        "bdw":  jax.random.normal(ks[1], (C, 1), jnp.float32) * 0.1,   # c1 bias
        "lng":  jnp.ones((C, 1), jnp.float32),                          # LayerNorm gamma
        "lnb":  jnp.zeros((C, 1), jnp.float32),                         # LayerNorm beta
        "w2":   jax.random.normal(ks[2], (H, C), jnp.float32) * 0.2,   # c2 weight (H, C)
        "b2":   jax.random.normal(ks[3], (H, 1), jnp.float32) * 0.1,   # c2 bias
        "grng": jax.random.normal(ks[4], (H, 1), jnp.float32) * 0.1,   # GRN gamma
        "grnb": jax.random.normal(ks[5], (H, 1), jnp.float32) * 0.1,   # GRN beta
        "w3":   jax.random.normal(ks[6], (C, H), jnp.float32) * 0.2,   # c3 weight (C, H)
        "b3":   jax.random.normal(ks[7], (C, 1), jnp.float32) * 0.1,   # c3 bias
    }
    x = jax.random.normal(ks[8], (B, C, T), jnp.float32)

    out = jax.block_until_ready(convnext_layer(x, params))
    ref = reference(x, params)
    assert out.shape == (B, C, T)
    assert jnp.allclose(out, ref, atol=2e-4, rtol=2e-4), "mismatch vs JAX reference"
    print("KERNEL_OK")
</pallas_src>

<mosaic_0001>
module attributes {stable_mosaic.version = 11 : i64} {
  func.func @convnext_kernel(%arg0: i32, %arg1: memref<1x8x256xf32, #tpu.memory_space<vmem>>, %arg2: memref<8x7xf32, #tpu.memory_space<vmem>>, %arg3: memref<8x1xf32, #tpu.memory_space<vmem>>, %arg4: memref<8x1xf32, #tpu.memory_space<vmem>>, %arg5: memref<8x1xf32, #tpu.memory_space<vmem>>, %arg6: memref<16x8xf32, #tpu.memory_space<vmem>>, %arg7: memref<16x1xf32, #tpu.memory_space<vmem>>, %arg8: memref<16x1xf32, #tpu.memory_space<vmem>>, %arg9: memref<16x1xf32, #tpu.memory_space<vmem>>, %arg10: memref<8x16xf32, #tpu.memory_space<vmem>>, %arg11: memref<8x1xf32, #tpu.memory_space<vmem>>, %arg12: memref<1x8x256xf32, #tpu.memory_space<vmem>>) attributes {dimension_semantics = [#tpu.dimension_semantics<parallel>], iteration_bounds = array<i64: 2>, scalar_prefetch = 0 : i64, scratch_operands = 0 : i64, tpu.core_type = #tpu.core_type<tc>, window_params = [{transform_indices = @transform_0, window_bounds = array<i64: 1, 8, 256>}, {pipeline_mode = #tpu.pipeline_mode<synchronous>, transform_indices = @transform_1, window_bounds = array<i64: 8, 7>}, {pipeline_mode = #tpu.pipeline_mode<synchronous>, transform_indices = @transform_2, window_bounds = array<i64: 8, 1>}, {pipeline_mode = #tpu.pipeline_mode<synchronous>, transform_indices = @transform_3, window_bounds = array<i64: 8, 1>}, {pipeline_mode = #tpu.pipeline_mode<synchronous>, transform_indices = @transform_4, window_bounds = array<i64: 8, 1>}, {pipeline_mode = #tpu.pipeline_mode<synchronous>, transform_indices = @transform_5, window_bounds = array<i64: 16, 8>}, {pipeline_mode = #tpu.pipeline_mode<synchronous>, transform_indices = @transform_6, window_bounds = array<i64: 16, 1>}, {pipeline_mode = #tpu.pipeline_mode<synchronous>, transform_indices = @transform_7, window_bounds = array<i64: 16, 1>}, {pipeline_mode = #tpu.pipeline_mode<synchronous>, transform_indices = @transform_8, window_bounds = array<i64: 16, 1>}, {pipeline_mode = #tpu.pipeline_mode<synchronous>, transform_indices = @transform_9, window_bounds = array<i64: 8, 16>}, {pipeline_mode = #tpu.pipeline_mode<synchronous>, transform_indices = @transform_10, window_bounds = array<i64: 8, 1>}, {transform_indices = @transform_11, window_bounds = array<i64: 1, 8, 256>}]} {
    %c0 = arith.constant 0 : index
    %c0_0 = arith.constant 0 : index
    %c0_1 = arith.constant 0 : index
    %0 = vector.load %arg1[%c0, %c0_0, %c0_1] : memref<1x8x256xf32, #tpu.memory_space<vmem>>, vector<1x8x256xf32>
    %1 = vector.shape_cast %0 : vector<1x8x256xf32> to vector<8x256xf32>
    %c0_2 = arith.constant 0 : index
    %c0_3 = arith.constant 0 : index
    %2 = vector.load %arg2[%c0_2, %c0_3] : memref<8x7xf32, #tpu.memory_space<vmem>>, vector<8x7xf32>
    %3 = tpu.iota {dimensions = array<i32: 1>} : vector<8x256xi32>
    %4 = vector.extract_strided_slice %2 {offsets = [0, 3], sizes = [8, 1], strides = [1, 1]} : vector<8x7xf32> to vector<8x1xf32>
    %5 = vector.broadcast %4 : vector<8x1xf32> to vector<8x256xf32>
    %6 = arith.mulf %1, %5 : vector<8x256xf32>
    %c3_i32 = arith.constant 3 : i32
    %7 = tpu.dynamic_rotate %1 by %c3_i32 dim 1 : vector<8x256xf32>, i32 -> vector<8x256xf32>
    %c3_i32_4 = arith.constant 3 : i32
    %8 = vector.broadcast %c3_i32_4 : i32 to vector<8x256xi32>
    %9 = arith.cmpi sge, %3, %8 : vector<8x256xi32>
    %cst = arith.constant 0.000000e+00 : f32
    %10 = vector.broadcast %cst : f32 to vector<8x256xf32>
    %11 = arith.select %9, %7, %10 : vector<8x256xi1>, vector<8x256xf32>
    %12 = vector.extract_strided_slice %2 {offsets = [0, 0], sizes = [8, 1], strides = [1, 1]} : vector<8x7xf32> to vector<8x1xf32>
    %13 = vector.broadcast %12 : vector<8x1xf32> to vector<8x256xf32>
    %14 = arith.mulf %11, %13 : vector<8x256xf32>
    %15 = arith.addf %6, %14 : vector<8x256xf32>
    %c2_i32 = arith.constant 2 : i32
    %16 = tpu.dynamic_rotate %1 by %c2_i32 dim 1 : vector<8x256xf32>, i32 -> vector<8x256xf32>
    %c2_i32_5 = arith.constant 2 : i32
    %17 = vector.broadcast %c2_i32_5 : i32 to vector<8x256xi32>
    %18 = arith.cmpi sge, %3, %17 : vector<8x256xi32>
    %cst_6 = arith.constant 0.000000e+00 : f32
    %19 = vector.broadcast %cst_6 : f32 to vector<8x256xf32>
    %20 = arith.select %18, %16, %19 : vector<8x256xi1>, vector<8x256xf32>
    %21 = vector.extract_strided_slice %2 {offsets = [0, 1], sizes = [8, 1], strides = [1, 1]} : vector<8x7xf32> to vector<8x1xf32>
    %22 = vector.broadcast %21 : vector<8x1xf32> to vector<8x256xf32>
    %23 = arith.mulf %20, %22 : vector<8x256xf32>
    %24 = arith.addf %15, %23 : vector<8x256xf32>
    %c1_i32 = arith.constant 1 : i32
    %25 = tpu.dynamic_rotate %1 by %c1_i32 dim 1 : vector<8x256xf32>, i32 -> vector<8x256xf32>
    %c1_i32_7 = arith.constant 1 : i32
    %26 = vector.broadcast %c1_i32_7 : i32 to vector<8x256xi32>
    %27 = arith.cmpi sge, %3, %26 : vector<8x256xi32>
    %cst_8 = arith.constant 0.000000e+00 : f32
    %28 = vector.broadcast %cst_8 : f32 to vector<8x256xf32>
    %29 = arith.select %27, %25, %28 : vector<8x256xi1>, vector<8x256xf32>
    %30 = vector.extract_strided_slice %2 {offsets = [0, 2], sizes = [8, 1], strides = [1, 1]} : vector<8x7xf32> to vector<8x1xf32>
    %31 = vector.broadcast %30 : vector<8x1xf32> to vector<8x256xf32>
    %32 = arith.mulf %29, %31 : vector<8x256xf32>
    %33 = arith.addf %24, %32 : vector<8x256xf32>
    %c255_i32 = arith.constant 255 : i32
    %34 = tpu.dynamic_rotate %1 by %c255_i32 dim 1 : vector<8x256xf32>, i32 -> vector<8x256xf32>
    %c255_i32_9 = arith.constant 255 : i32
    %35 = vector.broadcast %c255_i32_9 : i32 to vector<8x256xi32>
    %36 = arith.cmpi slt, %3, %35 : vector<8x256xi32>
    %cst_10 = arith.constant 0.000000e+00 : f32
    %37 = vector.broadcast %cst_10 : f32 to vector<8x256xf32>
    %38 = arith.select %36, %34, %37 : vector<8x256xi1>, vector<8x256xf32>
    %39 = vector.extract_strided_slice %2 {offsets = [0, 4], sizes = [8, 1], strides = [1, 1]} : vector<8x7xf32> to vector<8x1xf32>
    %40 = vector.broadcast %39 : vector<8x1xf32> to vector<8x256xf32>
    %41 = arith.mulf %38, %40 : vector<8x256xf32>
    %42 = arith.addf %33, %41 : vector<8x256xf32>
    %c254_i32 = arith.constant 254 : i32
    %43 = tpu.dynamic_rotate %1 by %c254_i32 dim 1 : vector<8x256xf32>, i32 -> vector<8x256xf32>
    %c254_i32_11 = arith.constant 254 : i32
    %44 = vector.broadcast %c254_i32_11 : i32 to vector<8x256xi32>
    %45 = arith.cmpi slt, %3, %44 : vector<8x256xi32>
    %cst_12 = arith.constant 0.000000e+00 : f32
    %46 = vector.broadcast %cst_12 : f32 to vector<8x256xf32>
    %47 = arith.select %45, %43, %46 : vector<8x256xi1>, vector<8x256xf32>
    %48 = vector.extract_strided_slice %2 {offsets = [0, 5], sizes = [8, 1], strides = [1, 1]} : vector<8x7xf32> to vector<8x1xf32>
    %49 = vector.broadcast %48 : vector<8x1xf32> to vector<8x256xf32>
    %50 = arith.mulf %47, %49 : vector<8x256xf32>
    %51 = arith.addf %42, %50 : vector<8x256xf32>
    %c253_i32 = arith.constant 253 : i32
    %52 = tpu.dynamic_rotate %1 by %c253_i32 dim 1 : vector<8x256xf32>, i32 -> vector<8x256xf32>
    %c253_i32_13 = arith.constant 253 : i32
    %53 = vector.broadcast %c253_i32_13 : i32 to vector<8x256xi32>
    %54 = arith.cmpi slt, %3, %53 : vector<8x256xi32>
    %cst_14 = arith.constant 0.000000e+00 : f32
    %55 = vector.broadcast %cst_14 : f32 to vector<8x256xf32>
    %56 = arith.select %54, %52, %55 : vector<8x256xi1>, vector<8x256xf32>
    %57 = vector.extract_strided_slice %2 {offsets = [0, 6], sizes = [8, 1], strides = [1, 1]} : vector<8x7xf32> to vector<8x1xf32>
    %58 = vector.broadcast %57 : vector<8x1xf32> to vector<8x256xf32>
    %59 = arith.mulf %56, %58 : vector<8x256xf32>
    %60 = arith.addf %51, %59 : vector<8x256xf32>
    %c0_15 = arith.constant 0 : index
    %c0_16 = arith.constant 0 : index
    %61 = vector.load %arg3[%c0_15, %c0_16] : memref<8x1xf32, #tpu.memory_space<vmem>>, vector<8x1xf32>
    %62 = vector.broadcast %61 : vector<8x1xf32> to vector<8x256xf32>
    %63 = arith.addf %60, %62 : vector<8x256xf32>
    %cst_17 = arith.constant dense<0.000000e+00> : vector<256xf32>
    %64 = vector.multi_reduction <add>, %63, %cst_17 [0] : vector<8x256xf32> to vector<256xf32>
    %65 = vector.shape_cast %64 : vector<256xf32> to vector<1x256xf32>
    %cst_18 = arith.constant 8.000000e+00 : f32
    %66 = vector.broadcast %cst_18 : f32 to vector<1x256xf32>
    %67 = arith.divf %65, %66 : vector<1x256xf32>
    %68 = vector.broadcast %67 : vector<1x256xf32> to vector<8x256xf32>
    %69 = arith.subf %63, %68 : vector<8x256xf32>
    %70 = arith.mulf %69, %69 : vector<8x256xf32>
    %cst_19 = arith.constant dense<0.000000e+00> : vector<256xf32>
    %71 = vector.multi_reduction <add>, %70, %cst_19 [0] : vector<8x256xf32> to vector<256xf32>
    %72 = vector.shape_cast %71 : vector<256xf32> to vector<1x256xf32>
    %cst_20 = arith.constant 8.000000e+00 : f32
    %73 = vector.broadcast %cst_20 : f32 to vector<1x256xf32>
    %74 = arith.divf %72, %73 : vector<1x256xf32>
    %75 = vector.broadcast %67 : vector<1x256xf32> to vector<8x256xf32>
    %76 = arith.subf %63, %75 : vector<8x256xf32>
    %cst_21 = arith.constant 9.99999974E-6 : f32
    %77 = vector.broadcast %cst_21 : f32 to vector<1x256xf32>
    %78 = arith.addf %74, %77 : vector<1x256xf32>
    %79 = math.rsqrt %78 : vector<1x256xf32>
    %80 = vector.broadcast %79 : vector<1x256xf32> to vector<8x256xf32>
    %81 = arith.mulf %76, %80 : vector<8x256xf32>
    %c0_22 = arith.constant 0 : index
    %c0_23 = arith.constant 0 : index
    %82 = vector.load %arg4[%c0_22, %c0_23] : memref<8x1xf32, #tpu.memory_space<vmem>>, vector<8x1xf32>
    %83 = vector.broadcast %82 : vector<8x1xf32> to vector<8x256xf32>
    %84 = arith.mulf %81, %83 : vector<8x256xf32>
    %c0_24 = arith.constant 0 : index
    %c0_25 = arith.constant 0 : index
    %85 = vector.load %arg5[%c0_24, %c0_25] : memref<8x1xf32, #tpu.memory_space<vmem>>, vector<8x1xf32>
    %86 = vector.broadcast %85 : vector<8x1xf32> to vector<8x256xf32>
    %87 = arith.addf %84, %86 : vector<8x256xf32>
    %c0_26 = arith.constant 0 : index
    %c0_27 = arith.constant 0 : index
    %88 = vector.load %arg6[%c0_26, %c0_27] : memref<16x8xf32, #tpu.memory_space<vmem>>, vector<16x8xf32>
    %cst_28 = arith.constant dense<0.000000e+00> : vector<16x256xf32>
    %89 = tpu.matmul %88, %87, %cst_28 {dimension_numbers = #tpu.dot_dimension_numbers<[1], [0], [0], [1], [0, 0, 1, 1], [], []>} : vector<16x8xf32>, vector<8x256xf32>, vector<16x256xf32> -> vector<16x256xf32>
    %c0_29 = arith.constant 0 : index
    %c0_30 = arith.constant 0 : index
    %90 = vector.load %arg7[%c0_29, %c0_30] : memref<16x1xf32, #tpu.memory_space<vmem>>, vector<16x1xf32>
    %91 = vector.broadcast %90 : vector<16x1xf32> to vector<16x256xf32>
    %92 = arith.addf %89, %91 : vector<16x256xf32>
    %cst_31 = arith.constant 5.000000e-01 : f32
    %93 = vector.broadcast %cst_31 : f32 to vector<16x256xf32>
    %94 = arith.mulf %93, %92 : vector<16x256xf32>
    %cst_32 = arith.constant 0.707106769 : f32
    %95 = vector.broadcast %cst_32 : f32 to vector<16x256xf32>
    %96 = arith.mulf %92, %95 : vector<16x256xf32>
    %97 = math.erf %96 : vector<16x256xf32>
    %cst_33 = arith.constant 1.000000e+00 : f32
    %98 = vector.broadcast %cst_33 : f32 to vector<16x256xf32>
    %99 = arith.addf %98, %97 : vector<16x256xf32>
    %100 = arith.mulf %94, %99 : vector<16x256xf32>
    %101 = arith.mulf %100, %100 : vector<16x256xf32>
    %cst_34 = arith.constant dense<0.000000e+00> : vector<16xf32>
    %102 = vector.multi_reduction <add>, %101, %cst_34 [1] : vector<16x256xf32> to vector<16xf32>
    %103 = vector.shape_cast %102 : vector<16xf32> to vector<16x1xf32>
    %104 = math.sqrt %103 : vector<16x1xf32>
    %cst_35 = arith.constant dense<0.000000e+00> : vector<1xf32>
    %105 = vector.multi_reduction <add>, %104, %cst_35 [0] : vector<16x1xf32> to vector<1xf32>
    %106 = vector.shape_cast %105 : vector<1xf32> to vector<1x1xf32>
    %cst_36 = arith.constant 1.600000e+01 : f32
    %107 = vector.broadcast %cst_36 : f32 to vector<1x1xf32>
    %108 = arith.divf %106, %107 : vector<1x1xf32>
    %cst_37 = arith.constant 9.99999997E-7 : f32
    %109 = vector.broadcast %cst_37 : f32 to vector<1x1xf32>
    %110 = arith.addf %108, %109 : vector<1x1xf32>
    %111 = vector.broadcast %110 : vector<1x1xf32> to vector<16x1xf32>
    %112 = arith.divf %104, %111 : vector<16x1xf32>
    %c0_38 = arith.constant 0 : index
    %c0_39 = arith.constant 0 : index
    %113 = vector.load %arg8[%c0_38, %c0_39] : memref<16x1xf32, #tpu.memory_space<vmem>>, vector<16x1xf32>
    %114 = vector.broadcast %112 : vector<16x1xf32> to vector<16x256xf32>
    %115 = arith.mulf %100, %114 : vector<16x256xf32>
    %116 = vector.broadcast %113 : vector<16x1xf32> to vector<16x256xf32>
    %117 = arith.mulf %116, %115 : vector<16x256xf32>
    %c0_40 = arith.constant 0 : index
    %c0_41 = arith.constant 0 : index
    %118 = vector.load %arg9[%c0_40, %c0_41] : memref<16x1xf32, #tpu.memory_space<vmem>>, vector<16x1xf32>
    %119 = vector.broadcast %118 : vector<16x1xf32> to vector<16x256xf32>
    %120 = arith.addf %117, %119 : vector<16x256xf32>
    %121 = arith.addf %120, %100 : vector<16x256xf32>
    %c0_42 = arith.constant 0 : index
    %c0_43 = arith.constant 0 : index
    %122 = vector.load %arg10[%c0_42, %c0_43] : memref<8x16xf32, #tpu.memory_space<vmem>>, vector<8x16xf32>
    %cst_44 = arith.constant dense<0.000000e+00> : vector<8x256xf32>
    %123 = tpu.matmul %122, %121, %cst_44 {dimension_numbers = #tpu.dot_dimension_numbers<[1], [0], [0], [1], [0, 0, 1, 1], [], []>} : vector<8x16xf32>, vector<16x256xf32>, vector<8x256xf32> -> vector<8x256xf32>
    %c0_45 = arith.constant 0 : index
    %c0_46 = arith.constant 0 : index
    %124 = vector.load %arg11[%c0_45, %c0_46] : memref<8x1xf32, #tpu.memory_space<vmem>>, vector<8x1xf32>
    %125 = vector.broadcast %124 : vector<8x1xf32> to vector<8x256xf32>
    %126 = arith.addf %123, %125 : vector<8x256xf32>
    %127 = arith.addf %126, %1 : vector<8x256xf32>
    %c0_47 = arith.constant 0 : index
    %c0_48 = arith.constant 0 : index
    %c0_49 = arith.constant 0 : index
    %128 = vector.load %arg12[%c0_47, %c0_48, %c0_49] : memref<1x8x256xf32, #tpu.memory_space<vmem>>, vector<1x8x256xf32>
    %129 = vector.shape_cast %128 : vector<1x8x256xf32> to vector<8x256xf32>
    %130 = vector.shape_cast %127 : vector<8x256xf32> to vector<1x8x256xf32>
    tpu.vector_store %arg12[%c0_47, %c0_48, %c0_49], %130 {strides = array<i32>} : memref<1x8x256xf32, #tpu.memory_space<vmem>>, vector<1x8x256xf32>,
    return
  }
  func.func @transform_0(%arg0: i32) -> (i32, i32, i32) {
    %c0_i32 = arith.constant 0 : i32
    %c0_i32_0 = arith.constant 0 : i32
    %c0_i32_1 = arith.constant 0 : i32
    return %arg0, %c0_i32, %c0_i32_0 : i32, i32, i32
  }
  func.func @transform_1(%arg0: i32) -> (i32, i32) {
    %c0_i32 = arith.constant 0 : i32
    %c0_i32_0 = arith.constant 0 : i32
    %c0_i32_1 = arith.constant 0 : i32
    return %c0_i32, %c0_i32_0 : i32, i32
  }
  func.func @transform_2(%arg0: i32) -> (i32, i32) {
    %c0_i32 = arith.constant 0 : i32
    %c0_i32_0 = arith.constant 0 : i32
    %c0_i32_1 = arith.constant 0 : i32
    return %c0_i32, %c0_i32_0 : i32, i32
  }
  func.func @transform_3(%arg0: i32) -> (i32, i32) {
    %c0_i32 = arith.constant 0 : i32
    %c0_i32_0 = arith.constant 0 : i32
    %c0_i32_1 = arith.constant 0 : i32
    return %c0_i32, %c0_i32_0 : i32, i32
  }
  func.func @transform_4(%arg0: i32) -> (i32, i32) {
    %c0_i32 = arith.constant 0 : i32
    %c0_i32_0 = arith.constant 0 : i32
    %c0_i32_1 = arith.constant 0 : i32
    return %c0_i32, %c0_i32_0 : i32, i32
  }
  func.func @transform_5(%arg0: i32) -> (i32, i32) {
    %c0_i32 = arith.constant 0 : i32
    %c0_i32_0 = arith.constant 0 : i32
    %c0_i32_1 = arith.constant 0 : i32
    return %c0_i32, %c0_i32_0 : i32, i32
  }
  func.func @transform_6(%arg0: i32) -> (i32, i32) {
    %c0_i32 = arith.constant 0 : i32
    %c0_i32_0 = arith.constant 0 : i32
    %c0_i32_1 = arith.constant 0 : i32
    return %c0_i32, %c0_i32_0 : i32, i32
  }
  func.func @transform_7(%arg0: i32) -> (i32, i32) {
    %c0_i32 = arith.constant 0 : i32
    %c0_i32_0 = arith.constant 0 : i32
    %c0_i32_1 = arith.constant 0 : i32
    return %c0_i32, %c0_i32_0 : i32, i32
  }
  func.func @transform_8(%arg0: i32) -> (i32, i32) {
    %c0_i32 = arith.constant 0 : i32
    %c0_i32_0 = arith.constant 0 : i32
    %c0_i32_1 = arith.constant 0 : i32
    return %c0_i32, %c0_i32_0 : i32, i32
  }
  func.func @transform_9(%arg0: i32) -> (i32, i32) {
    %c0_i32 = arith.constant 0 : i32
    %c0_i32_0 = arith.constant 0 : i32
    %c0_i32_1 = arith.constant 0 : i32
    return %c0_i32, %c0_i32_0 : i32, i32
  }
  func.func @transform_10(%arg0: i32) -> (i32, i32) {
    %c0_i32 = arith.constant 0 : i32
    %c0_i32_0 = arith.constant 0 : i32
    %c0_i32_1 = arith.constant 0 : i32
    return %c0_i32, %c0_i32_0 : i32, i32
  }
  func.func @transform_11(%arg0: i32) -> (i32, i32, i32) {
    %c0_i32 = arith.constant 0 : i32
    %c0_i32_0 = arith.constant 0 : i32
    %c0_i32_1 = arith.constant 0 : i32
    return %arg0, %c0_i32, %c0_i32_0 : i32, i32, i32
  }
}

</mosaic_0001>

<bundles_post_ra>
// kernel: tpu_custom_call.1
= control target key start
LH: loop header
LB: loop body
LE: loop exit
PB: predicated region body
PF: predicated region fallthrough
CT: control target
= control target key end

     0   :  { %s1344_s0 = inlined_call_operand.vmem [shape: f32[2,8,256], index: 0, kind: input, shape index: {}]   ;;  %s1345_s1 = inlined_call_operand.vmem [shape: f32[8,7], index: 1, kind: input, shape index: {}]   ;;  %s1346_s2 = inlined_call_operand.vmem [shape: f32[8,1], index: 2, kind: input, shape index: {}]   ;;  %s1347_s3 = inlined_call_operand.vmem [shape: f32[8,1], index: 3, kind: input, shape index: {}]   ;;  %s1348_s4 = inlined_call_operand.vmem [shape: f32[8,1], index: 4, kind: input, shape index: {}]   ;;  %s1349_s5 = inlined_call_operand.vmem [shape: f32[16,8], index: 5, kind: input, shape index: {}]   ;;  %s1350_s6 = inlined_call_operand.vmem [shape: f32[16,1], index: 6, kind: input, shape index: {}]   ;;  %s1351_s7 = inlined_call_operand.vmem [shape: f32[16,1], index: 7, kind: input, shape index: {}]   ;;  %s1352_s8 = inlined_call_operand.vmem [shape: f32[16,1], index: 8, kind: input, shape index: {}]   ;;  %s1353_s9 = inlined_call_operand.vmem [shape: f32[8,16], index: 9, kind: input, shape index: {}]   ;;  %s1354_s10 = inlined_call_operand.vmem [shape: f32[8,1], index: 10, kind: input, shape index: {}]   ;;  %s1355_s11 = inlined_call_operand.hbm [shape: f32[2,8,256], index: 11, kind: output, shape index: {}]  }
   0x1   :  { %1356 = sst [smem:[#allocation5_spill]] %s1344_s0 }
   0x2   :  { %1357 = sst [smem:[#allocation6_spill]] %s1345_s1 }
   0x3   :  { %16 = vsyncpa [#allocation3], 0 }
   0x4   :  { %18 = vsyncpa [#allocation3 + $0x1], 0  ;;  %s1164_s17 = smov 0   ;;  %s1166_s18 = smov 0  }
   0x5   :  { %s1168_s19 = smov 0   ;;  %s1170_s20 = smov 0  }
   0x6 LB: > { %s1185_s21 = sadd.s32 4294967295, %s1087_s20   ;;  %s930_s22 = sadd.s32 4294967294, %s1087_s20   ;;  %s1087_s20 = sphi %s1170_s20, %s1365_s20   ;;  %s1083_s19 = sphi %s1168_s19, %s1364_s19   ;;  %s1079_s18 = sphi %s1166_s18, %s1363_s18   ;;  %s1075_s17 = sphi %s1164_s17, %s1362_s17  }
   0x7   : > { %s1189_s23 = sadd.s32 1, %s1087_s20   ;;  %s267_s24 = sadd.s32 1, %s1083_s19 }
   0x8   : > { %s264_s25 = ssub.s32 %s1087_s20, %s1189_s23  ;;  %p277_p0 = scmp.ne.s32.totalorder %s1083_s19, %s1079_s18 }
   0x9   : > { %p265_p1 = scmp.eq.s32.totalorder %s264_s25, 0  ;;  %p278_p2 = scmp.eq.s32.totalorder %s1185_s21, 1 }
   0xa   : > { %p283_p3 = scmp.ne.s32.totalorder %s1079_s18, %s1075_s17  ;;  %p284_p4 = scmp.eq.s32.totalorder %s930_s22, 1 }
   0xb   : > { %s1200_s26 = scalar_select %p265_p1, %s1083_s19, %s267_s24  }
   0xc   : > { %p1202_p5 = por %p278_p2, %p277_p0  ;;  %p1206_p6 = por %p284_p4, %p283_p3 }
   0xd   : > { %p933_p7 = scmp.ge.s32.totalorder %s1087_s20, 1  ;;  %p340_p8 = scmp.lt.s32.totalorder %s1087_s20, 3 }
   0xf   : > { %p341_p9 = pnand %p933_p7, %p340_p8 }
  0x10   : > { %s1360_s1 = sld [smem:[#allocation6_spill]] (!%p341_p9)  ;;  %p380_p10 = scmp.lt.s32.totalorder (!%p341_p9), %s1185_s21, 1 }
  0x11   : > { %344 = sbr.rel (%p341_p9) target bundleno = 895 (0x37f), region = 64  ;;  %s1361_s0 = sld [smem:[#allocation5_spill]] (!%p341_p9) }
  0x12   : > { %s1092_s22 = smov (!%p341_p9), 3   ;;  %s1094_s24 = smov (!%p341_p9), 2  }
  0x13   : > { %s1097_s25 = smov (!%p341_p9), 1   ;;  %s1099_s29 = smov (!%p341_p9), 127  }
  0x14   : > { %s1100_s30 = smov (!%p341_p9), 125  }
  0x16   : > { %v387_v0 = vld [vmem:[%s1360_s1] sm:$0xff]  ;;  %v1089_v1 = vmov 1   ;;  %v1090_v2 = vmov 3   ;;  %s381_s12 = scalar_select %p380_p10, %s1185_s21, 1  ;;  %v1091_v3 = vmov 0   ;;  %v1093_v6 = vmov 2  }
  0x17   : > { %1002 = vset.pattern.permute.xlu1 %v1089_v1  ;;  %1000 = vset.pattern.permute.xlu0 %v1090_v2  ;;  %v1095_v7 = vmov 4   ;;  %v1096_v8 = vmov 5   ;;  %v1098_v9 = vmov 6   ;;  %v512_v10 = vld [vmem:[%s1346_s2] sm:$0xff]  ;;  %v578_v14 = vld [vmem:[%s1350_s6 + $0x8] sm:$0xff]  ;;  %v1102_v15 = vmov 0.0  }
  0x18   : > { %429 = vperm.xlu1 %1002, %v387_v0   ;;  %393 = vperm.xlu0 %1000, %v387_v0   ;;  %s945_s13 = sshll.u32 %s381_s12, 4  ;;  %v577_v11 = vld [vmem:[%s1350_s6] sm:$0xff]  ;;  %v388_v23 = vlaneseq  ;;  %vm589_vm12 = vcmask 64512   ;;  %s946_s12 = sshll.u32 %s1185_s21, 8 }
  0x19   : > { %s384_s16 = scalar_lea.vmem %s1361_s0, %s945_s13  ;;  %v559_v12 = vld [vmem:[%s1347_s3] sm:$0xff]  ;;  %660 = vmatprep.mubr.f32.mxu0 %v1102_v15  ;;  %845 = vmatprep.mubr.f32.mxu1 %v1102_v15  ;;  %s1103_s21 = smov [#allocation2]  }
  0x1a   : > { %v1220_v4 = vld [vmem:[%s384_s16] sm:$0xff]  ;;  %v1223_v5 = vld [vmem:[%s384_s16 + $0x8] sm:$0xff]  ;;  %s1101_s16 = smov 126   ;;  %v389_v26 = vand.u32 127, %v388_v23 }
  0x1b   : > { %v567_v13 = vld [vmem:[%s1348_s4] sm:$0xff] }
  0x1c   : > { %1001 = vset.pattern.permute.xlu0 %v1091_v3  ;;  %1008 = vset.pattern.permute.xlu1 %v1091_v3  ;;  %vm402_vm0 = vcmp.lt.s32.totalorder %v389_v26, 3  ;;  %vm421_vm1 = vcmp.lt.s32.totalorder %v389_v26, 2  ;;  %vm405_vm2 = vcmp.ge.s32.totalorder %v389_v26, 3  ;;  %vm440_vm3 = vcmp.lt.s32.totalorder %v389_v26, 1 }
  0x1d   : > { %410 = vperm.xlu0 %1001, %v387_v0   ;;  %398 = vrot.lane.b32.xlu1 %v1220_v4, %s1092_s22  ;;  %vm424_vm4 = vcmp.ge.s32.totalorder %v389_v26, 2  ;;  %v390_v32 = vadd.s32 128, %v389_v26  ;;  %vm443_vm5 = vcmp.ge.s32.totalorder %v389_v26, 1  ;;  %vm459_vm6 = vcmp.lt.s32.totalorder %v389_v26, 127 }
  0x1e   : > { %vm478_vm8 = vcmp.lt.s32.totalorder %v389_v26, 126  ;;  %vm497_vm10 = vcmp.lt.s32.totalorder %v389_v26, 125 }
  0x1f   : > { %vm463_vm7 = vcmp.lt.s32.totalorder %v390_v32, 255  ;;  %vm482_vm9 = vcmp.lt.s32.totalorder %v390_v32, 254  ;;  %vm501_vm11 = vcmp.lt.s32.totalorder %v390_v32, 253 }
  0x21   : > { %1003 = vset.pattern.permute.xlu0 %v1093_v6  ;;  %400 = vrot.lane.b32.xlu1 %v1223_v5, %s1092_s22 }
  0x22   : > { %448 = vperm.xlu0 %1003, %v387_v0  }
  0x25   : > { %417 = vrot.lane.b32.xlu1 %v1220_v4, %s1094_s24 }
  0x26   : > { %1004 = vset.pattern.permute.xlu0 %v1095_v7 }
  0x27   : > { %467 = vperm.xlu0 %1004, %v387_v0  }
  0x29   : > { %419 = vrot.lane.b32.xlu1 %v1223_v5, %s1094_s24 }
  0x2b   : > { %1005 = vset.pattern.permute.xlu0 %v1096_v8 }
  0x2c   : > { %486 = vperm.xlu0 %1005, %v387_v0  }
  0x2d   : > { %436 = vrot.lane.b32.xlu1 %v1220_v4, %s1097_s25 }
  0x30   : > { %1006 = vset.pattern.permute.xlu0 %v1098_v9 }
  0x31   : > { %505 = vperm.xlu0 %1006, %v387_v0   ;;  %438 = vrot.lane.b32.xlu1 %v1223_v5, %s1097_s25  ;;  %s377_s25 = sand.u32 1, %s1079_s18  }
  0x32   : > { %s857_s22 = scalar_lea.sflag [#allocation3], %s377_s25 }
  0x35   : > { %455 = vrot.lane.b32.xlu1 %v1220_v4, %s1099_s29  ;;  %493 = vrot.lane.b32.xlu0 %v1220_v4, %s1100_s30 }
  0x36   : > { %1007 = vset.pattern.permute.xlu0 %v1091_v3 }
  0x39   : > { %457 = vrot.lane.b32.xlu1 %v1223_v5, %s1099_s29  ;;  %515 = vperm.xlu0 %1007, %v512_v10   ;;  %s934_s29 = sshll.u32 %s377_s25, 4 }
  0x3a   : > { %s379_s13 = scalar_lea.vmem [#allocation2], %s934_s29  ;;  %s1031_s29 = sshll.u32 %s1103_s21, 4  ;;  %s1032_s29 = int_to_ptr.vmem [resolvable:$false] %s1031_s29 }
  0x3b   : > { %s1033_s0 = scalar_lea.vmem %s1032_s29, 512 }
  0x3d   : > { %474 = vrot.lane.b32.xlu1 %v1220_v4, %s1101_s16  ;;  %581 = vperm.xlu0 %1007, %v577_v11  }
  0x41   : > { %476 = vrot.lane.b32.xlu1 %v1223_v5, %s1101_s16  ;;  %s869_s16 = scalar_lea.hbm %s1355_s11, %s946_s12 }
  0x45   : > { %495 = vrot.lane.b32.xlu1 %v1223_v5, %s1100_s30  ;;  %s871_s30 = sshll.u32 %s379_s13, 4  ;;  %s872_s30 = int_to_ptr.vmem [resolvable:$true] %s871_s30 }
  0x46   : > { %s1027_s24 = scalar_lea.vmem %s872_s30, 256  ;;  %p1034_p0 = scmp.lt.s32.totalorder %s872_s30, %s1032_s29 }
  0x47   : > { %p1028_p11 = scmp.ne.s32.totalorder %s872_s30, %s1027_s24  ;;  %p1035_p1 = scmp.lt.s32.totalorder %s1033_s0, %s1027_s24 }
  0x49   : > { %562 = vperm.xlu1 %1008, %v559_v12   ;;  %p1029_p12 = pnand %p1028_p11, %p1202_p5  ;;  %p1036_p2 = por %p1035_p1, %p1034_p0 }
  0x4b   : > { %p1030_p13 = pneg %p1029_p12 }
  0x4d   : > { %570 = vperm.xlu1 %1008, %v567_v13   ;;  %p1037_p3 = pnand %p1036_p2, %p1030_p13 }
  0x51   : > { %586 = vperm.xlu1 %1008, %v578_v14  }
  0x93   : > { %v430_v16 = vpop.permute.xlu1 %429  ;;  %v394_v19 = vpop.permute.xlu0 %393 }
  0x94   : > { %v396_v39 = vmul.f32 %v394_v19, %v1220_v4  ;;  %v397_v42 = vmul.f32 %v394_v19, %v1223_v5 }
  0x97   : > { %v399_v17 = vpop.permute.xlu1 %398 }
  0x98   : > { %v411_v21 = vpop.permute.xlu0 %410 }
  0x9b   : > { %v401_v18 = vpop.permute.xlu1 %400 }
  0x9c   : > { %v404_v29 = vsel %vm402_vm0, %v401_v18, %v399_v17  ;;  %v403_v34 = vsel %vm402_vm0, %v399_v17, %v401_v18 }
  0x9d   : > { %v449_v25 = vpop.permute.xlu0 %448  ;;  %v407_v33 = vsel %vm405_vm2, %v404_v29, 0.0  ;;  %v414_v43 = vmul.f32 %v411_v21, %v403_v34 }
  0x9e   : > { %v413_v40 = vmul.f32 %v411_v21, %v407_v33 }
  0x9f   : > { %v418_v20 = vpop.permute.xlu1 %417  ;;  %v416_v55 = vadd.f32 %v414_v43, %v397_v42 }
  0xa0   : > { %v415_v51 = vadd.f32 %v413_v40, %v396_v39 }
  0xa2   : > { %v468_v28 = vpop.permute.xlu0 %467 }
  0xa3   : > { %v420_v22 = vpop.permute.xlu1 %419 }
  0xa4   : > { %v423_v31 = vsel %vm421_vm1, %v420_v22, %v418_v20  ;;  %v422_v41 = vsel %vm421_vm1, %v418_v20, %v420_v22  ;;  %vm777_vm1 = vcmask 130048  }
  0xa5   : > { %v426_v38 = vsel %vm424_vm4, %v423_v31, 0.0  ;;  %v433_v49 = vmul.f32 %v430_v16, %v422_v41 }
  0xa6   : > { %v432_v46 = vmul.f32 %v430_v16, %v426_v38 }
  0xa7   : > { %v437_v24 = vpop.permute.xlu1 %436  ;;  %v487_v36 = vpop.permute.xlu0 %486  ;;  %v435_v60 = vadd.f32 %v433_v49, %v416_v55 }
  0xa8   : > { %v434_v57 = vadd.f32 %v432_v46, %v415_v51 }
  0xab   : > { %v439_v27 = vpop.permute.xlu1 %438 }
  0xac   : > { %v442_v35 = vsel %vm440_vm3, %v439_v27, %v437_v24  ;;  %v441_v47 = vsel %vm440_vm3, %v437_v24, %v439_v27  ;;  %v506_v54 = vpop.permute.xlu0 %505 }
  0xad   : > { %v445_v44 = vsel %vm443_vm5, %v442_v35, 0.0  ;;  %v452_v56 = vmul.f32 %v449_v25, %v441_v47 }
  0xae   : > { %v451_v52 = vmul.f32 %v449_v25, %v445_v44 }
  0xaf   : > { %v456_v30 = vpop.permute.xlu1 %455  ;;  %v454_v3 = vadd.f32 %v452_v56, %v435_v60 }
  0xb0   : > { %v453_v0 = vadd.f32 %v451_v52, %v434_v57  ;;  %v494_v8 = vpop.permute.xlu0 %493 }
  0xb3   : > { %v458_v37 = vpop.permute.xlu1 %457 }
  0xb4   : > { %v461_v45 = vsel %vm459_vm6, %v458_v37, %v456_v30  ;;  %v460_v50 = vsel %vm459_vm6, %v456_v30, %v458_v37  ;;  %v516_v20 = vpop.permute.xlu0 %515 }
  0xb5   : > { %v465_v53 = vsel %vm463_vm7, %v461_v45, 0.0  ;;  %v470_v58 = vmul.f32 %v468_v28, %v460_v50 }
  0xb6   : > { %v471_v61 = vmul.f32 %v468_v28, %v465_v53 }
  0xb7   : > { %v475_v48 = vpop.permute.xlu1 %474  ;;  %v472_v7 = vadd.f32 %v470_v58, %v453_v0 }
  0xb8   : > { %v473_v10 = vadd.f32 %v471_v61, %v454_v3 }
  0xbb   : > { %v477_v59 = vpop.permute.xlu1 %476 }
  0xbc   : > { %v479_v62 = vsel %vm478_vm8, %v475_v48, %v477_v59  ;;  %v480_v63 = vsel %vm478_vm8, %v477_v59, %v475_v48 }
  0xbd   : > { %v484_v1 = vsel %vm482_vm9, %v480_v63, 0.0  ;;  %v489_v2 = vmul.f32 %v487_v36, %v479_v62 }
  0xbe   : > { %v490_v6 = vmul.f32 %v487_v36, %v484_v1 }
  0xbf   : > { %v496_v9 = vpop.permute.xlu1 %495  ;;  %v491_v13 = vadd.f32 %v489_v2, %v472_v7  ;;  %v576_v7 = vld [vmem:[%s1349_s5 + $0x8] sm:$0xff] }
  0xc0   : > { %v498_v11 = vsel %vm497_vm10, %v494_v8, %v496_v9  ;;  %v499_v12 = vsel %vm497_vm10, %v496_v9, %v494_v8  ;;  %v492_v18 = vadd.f32 %v490_v6, %v473_v10  ;;  %v575_v6 = vld [vmem:[%s1349_s5] sm:$0xff]  ;;  %v582_v8 = vpop.permute.xlu0 %581 }
  0xc1   : > { %v503_v14 = vsel %vm501_vm11, %v499_v12, 0.0  ;;  %v508_v16 = vmul.f32 %v506_v54, %v498_v11 }
  0xc2   : > { %v509_v17 = vmul.f32 %v506_v54, %v503_v14 }
  0xc3   : > { %v510_v19 = vadd.f32 %v508_v16, %v491_v13 }
  0xc4   : > { %v511_v21 = vadd.f32 %v509_v17, %v492_v18  ;;  %v563_v58 = vpop.permute.xlu1 %562 }
  0xc5   : > { %v518_v22 = vadd.f32 %v516_v20, %v510_v19 }
  0xc6   : > { %v519_v23 = vadd.f32 %v516_v20, %v511_v21 }
  0xc7   : > { %v520_v24 = vrot.slane %v518_v22, 4 }
  0xc8   : > { %v526_v25 = vrot.slane %v519_v23, 4  ;;  %v571_v1 = vpop.permute.xlu1 %570 }
  0xc9   : > { %v521_v26 = vadd.f32 %v520_v24, %v518_v22 }
  0xca   : > { %v527_v27 = vadd.f32 %v526_v25, %v519_v23 }
  0xcb   : > { %v522_v28 = vrot.slane %v521_v26, 2 }
  0xcc   : > { %v528_v29 = vrot.slane %v527_v27, 2  ;;  %v587_v14 = vpop.permute.xlu1 %586 }
  0xcd   : > { %v523_v30 = vadd.f32 %v522_v28, %v521_v26 }
  0xce   : > { %v529_v31 = vadd.f32 %v528_v29, %v527_v27 }
  0xcf   : > { %v524_v32 = vrot.slane %v523_v30, 1 }
  0xd0   : > { %v530_v33 = vrot.slane %v529_v31, 1 }
  0xd1   : > { %v525_v34 = vadd.f32 %v524_v32, %v523_v30 }
  0xd2   : > { %v531_v35 = vadd.f32 %v530_v33, %v529_v31 }
  0xd3   : > { %v533_v36 = vmul.f32 0.125, %v525_v34 }
  0xd4   : > { %v534_v37 = vmul.f32 0.125, %v531_v35 }
  0xd5   : > { %v535_v38 = vsub.f32 %v518_v22, %v533_v36 }
  0xd6   : > { %v536_v39 = vsub.f32 %v519_v23, %v534_v37 }
  0xd7   : > { %v537_v40 = vmul.f32 %v535_v38, %v535_v38 }
  0xd8   : > { %v538_v41 = vmul.f32 %v536_v39, %v536_v39 }
  0xd9   : > { %v539_v42 = vrot.slane %v537_v40, 4 }
  0xda   : > { %v545_v43 = vrot.slane %v538_v41, 4 }
  0xdb   : > { %v540_v44 = vadd.f32 %v539_v42, %v537_v40 }
  0xdc   : > { %v546_v45 = vadd.f32 %v545_v43, %v538_v41 }
  0xdd   : > { %v541_v46 = vrot.slane %v540_v44, 2 }
  0xde   : > { %v547_v47 = vrot.slane %v546_v45, 2 }
  0xdf   : > { %v542_v48 = vadd.f32 %v541_v46, %v540_v44  ;;  %v730_v44 = vld [vmem:[%s1351_s7] sm:$0xff] }
  0xe0   : > { %v548_v49 = vadd.f32 %v547_v47, %v546_v45  ;;  %v731_v45 = vld [vmem:[%s1351_s7 + $0x8] sm:$0xff]  ;;  %v750_v46 = vld [vmem:[%s1352_s8] sm:$0xff] }
  0xe1   : > { %v543_v50 = vrot.slane %v542_v48, 1  ;;  %v751_v47 = vld [vmem:[%s1352_s8 + $0x8] sm:$0xff] }
  0xe2   : > { %v549_v51 = vrot.slane %v548_v49, 1 }
  0xe3   : > { %v544_v52 = vadd.f32 %v543_v50, %v542_v48  ;;  %v771_v48 = vld [vmem:[%s1354_s10] sm:$0xff] }
  0xe4   : > { %v550_v53 = vadd.f32 %v549_v51, %v548_v49 }
  0xe5   : > { %v551_v54 = vmul.f32 0.125, %v544_v52 }
  0xe6   : > { %v552_v55 = vmul.f32 0.125, %v550_v53 }
  0xe7   : > { %v553_v56 = vadd.f32 1e-05, %v551_v54 }
  0xe8   : > { %v554_v57 = vadd.f32 1e-05, %v552_v55 }
  0xe9   : > { %1009 = vrsqrt.f32 %v553_v56 }
  0xea   : > { %1011 = vrsqrt.f32 %v554_v57 }
  0xf6   : > { %v1010_v59 = vpop.eup %1009 }
  0xf7   : > { %v1012_v60 = vpop.eup %1011  ;;  %v557_v61 = vmul.f32 %v1010_v59, %v535_v38 }
  0xf8   : > { %v558_v62 = vmul.f32 %v1012_v60, %v536_v39 }
  0xf9   : > { %v565_v63 = vmul.f32 %v563_v58, %v557_v61 }
  0xfa   : > { %v566_v0 = vmul.f32 %v563_v58, %v558_v62 }
  0xfb   : > { %v573_v3 = vadd.f32 %v571_v1, %v565_v63 }
  0xfc   : > { %v574_v2 = vadd.f32 %v571_v1, %v566_v0 }
  0xfe   : > { %626 = vmatprep.subr.mxu0 %v574_v2 }
  0xff   : > { %627 = vmatpush1.msra.mxu0 %v573_v3 }
 0x100   : > { %937 = vmatmul.mubr.msk.f32.vlgmr.msra.gmra.mxu0 %vm589_vm12, %v575_v6 }
 0x101   : > { %666 = vmatprep.mubr.f32.mxu0 %v1102_v15 }
 0x104   : > { %938 = vmatmul.mubr.msk.f32.gmra.mxu0 %vm589_vm12, %v576_v7 }
 0x1c0   : > { %v662_v9 = vpop.f32.mrf.mxu0 }
 0x1c1   : > { %v663_v10 = vadd.f32 %v662_v9, %v582_v8 }
 0x1c2   : > { %v664_v11 = vpop.f32.mrf.mxu0 }
 0x1c3   : > { %v677_v12 = vmul.f32 0.70710677, %v663_v10  ;;  %v665_v13 = vadd.f32 %v664_v11, %v582_v8  ;;  %v673_v23 = vmul.f32 0.5, %v663_v10 }
 0x1c4   : > { %v668_v16 = vpop.f32.mrf.mxu0 }
 0x1c5   : > { %1013 = verf.f32 %v677_v12  ;;  %v678_v17 = vmul.f32 0.70710677, %v665_v13  ;;  %v669_v18 = vadd.f32 %v668_v16, %v587_v14  ;;  %v674_v27 = vmul.f32 0.5, %v665_v13 }
 0x1c6   : > { %v670_v19 = vpop.f32.mrf.mxu0 }
 0x1c7   : > { %1015 = verf.f32 %v678_v17  ;;  %v679_v20 = vmul.f32 0.70710677, %v669_v18  ;;  %v671_v15 = vadd.f32 %v670_v19, %v587_v14  ;;  %v675_v31 = vmul.f32 0.5, %v669_v18 }
 0x1c9   : > { %1017 = verf.f32 %v679_v20  ;;  %v680_v21 = vmul.f32 0.70710677, %v671_v15  ;;  %v676_v34 = vmul.f32 0.5, %v671_v15 }
 0x1cb   : > { %1019 = verf.f32 %v680_v21 }
 0x1d2   : > { %v1014_v22 = vpop.eup %1013 }
 0x1d3   : > { %v685_v24 = vadd.f32 1.0, %v1014_v22 }
 0x1d4   : > { %v1016_v25 = vpop.eup %1015 }
 0x1d5   : > { %v1266_v26 = vmul.f32 %v685_v24, %v673_v23  ;;  %v686_v28 = vadd.f32 1.0, %v1016_v25 }
 0x1d6   : > { %v1018_v29 = vpop.eup %1017 }
 0x1d7   : > { %v1268_v30 = vmul.f32 %v686_v28, %v674_v27  ;;  %v687_v32 = vadd.f32 1.0, %v1018_v29  ;;  %v693_v37 = vmul.f32 %v1266_v26, %v1266_v26 }
 0x1d8   : > { %v1020_v33 = vpop.eup %1019 }
 0x1d9   : > { %v1270_v35 = vmul.f32 %v687_v32, %v675_v31  ;;  %v688_v36 = vadd.f32 1.0, %v1020_v33  ;;  %v694_v38 = vmul.f32 %v1268_v30, %v1268_v30  ;;  %v770_v33 = vld [vmem:[%s1353_s9] sm:$0xff] }
 0x1db   : > { %v1276_v39 = vmul.f32 %v688_v36, %v676_v34  ;;  %v697_v40 = vadd.f32 %v694_v38, %v693_v37  ;;  %v695_v41 = vmul.f32 %v1270_v35, %v1270_v35 }
 0x1dd   : > { %698 = vadd.xlane.f32.xlu0 %v697_v40  ;;  %v696_v42 = vmul.f32 %v1276_v39, %v1276_v39 }
 0x1df   : > { %v700_v43 = vadd.f32 %v696_v42, %v695_v41 }
 0x1e1   : > { %701 = vadd.xlane.f32.xlu1 %v700_v43 }
 0x1f2   : > { %738 = vperm.xlu1 %1008, %v730_v44  }
 0x1f3   : > { %743 = vperm.xlu0 %1007, %v731_v45  }
 0x1f6   : > { %754 = vperm.xlu1 %1008, %v750_v46  }
 0x1f7   : > { %759 = vperm.xlu0 %1007, %v751_v47  }
 0x1fb   : > { %774 = vperm.xlu0 %1007, %v771_v48  }
 0x266   : > { %v699_v49 = vpop.xlane.xlu0 %698 }
 0x267   : > { %1021 = vrsqrt.f32 %v699_v49  ;;  %vm705_vm13 = vcmp.eq.f32.partialorder %v699_v49, inf  ;;  %v708_v57 = vand.u32 2147483648, %v699_v49  ;;  %vm707_vm0 = vcmp.eq.f32.partialorder %v699_v49, 0.0 }
 0x26a   : > { %v702_v50 = vpop.xlane.xlu1 %701 }
 0x26b   : > { %1023 = vrsqrt.f32 %v702_v50  ;;  %vm712_vm14 = vcmp.eq.f32.partialorder %v702_v50, inf  ;;  %v715_v56 = vand.u32 2147483648, %v702_v50  ;;  %vm714_vm15 = vcmp.eq.f32.partialorder %v702_v50, 0.0 }
 0x26e   : > { %v739_v9 = vpop.permute.xlu1 %738  ;;  %v744_v10 = vpop.permute.xlu0 %743 }
 0x272   : > { %v755_v21 = vpop.permute.xlu1 %754  ;;  %v760_v22 = vpop.permute.xlu0 %759 }
 0x274   : > { %v1022_v51 = vpop.eup %1021 }
 0x275   : > { %v704_v52 = vmul.f32 %v1022_v51, %v699_v49 }
 0x276   : > { %v775_v34 = vpop.permute.xlu0 %774 }
 0x277   : > { %v706_v55 = vsel %vm705_vm13, %v699_v49, %v704_v52 }
 0x278   : > { %v1024_v53 = vpop.eup %1023  ;;  %v709_v60 = vsel %vm707_vm0, %v708_v57, %v706_v55 }
 0x279   : > { %v711_v54 = vmul.f32 %v1024_v53, %v702_v50 }
 0x27b   : > { %v713_v58 = vsel %vm712_vm14, %v702_v50, %v711_v54 }
 0x27c   : > { %v716_v59 = vsel %vm714_vm15, %v715_v56, %v713_v58 }
 0x27d   : > { %v717_v61 = vadd.f32 %v716_v59, %v709_v60 }
 0x27f   : > { %v718_v62 = vrot.slane %v717_v61, 4 }
 0x281   : > { %v719_v63 = vadd.f32 %v718_v62, %v717_v61 }
 0x283   : > { %v720_v0 = vrot.slane %v719_v63, 2 }
 0x285   : > { %v721_v1 = vadd.f32 %v720_v0, %v719_v63 }
 0x287   : > { %v722_v2 = vrot.slane %v721_v1, 1 }
 0x289   : > { %v723_v3 = vadd.f32 %v722_v2, %v721_v1 }
 0x28b   : > { %v725_v6 = vmul.f32 0.0625, %v723_v3 }
 0x28d   : > { %v726_v7 = vadd.f32 1e-06, %v725_v6 }
 0x28f   : > { %1025 = vrcp.f32 %v726_v7 }
 0x29c   : > { %v1026_v8 = vpop.eup %1025 }
 0x29d   : > { %v728_v11 = vmul.f32 %v1026_v8, %v709_v60  ;;  %v729_v12 = vmul.f32 %v1026_v8, %v716_v59 }
 0x29f   : > { %v732_v13 = vmul.f32 %v728_v11, %v1266_v26  ;;  %v733_v14 = vmul.f32 %v728_v11, %v1268_v30  ;;  %v734_v16 = vmul.f32 %v729_v12, %v1270_v35  ;;  %v735_v17 = vmul.f32 %v729_v12, %v1276_v39 }
 0x2a1   : > { %v746_v18 = vmul.f32 %v739_v9, %v732_v13  ;;  %v747_v19 = vmul.f32 %v739_v9, %v733_v14  ;;  %v748_v20 = vmul.f32 %v744_v10, %v734_v16  ;;  %v749_v15 = vmul.f32 %v744_v10, %v735_v17 }
 0x2a3   : > { %v763_v23 = vadd.f32 %v755_v21, %v747_v19  ;;  %v764_v24 = vadd.f32 %v760_v22, %v748_v20  ;;  %v765_v25 = vadd.f32 %v760_v22, %v749_v15  ;;  %v762_v27 = vadd.f32 %v755_v21, %v746_v18 }
 0x2a5   : > { %v769_v28 = vadd.f32 %v765_v25, %v1276_v39  ;;  %v768_v29 = vadd.f32 %v764_v24, %v1270_v35  ;;  %v767_v31 = vadd.f32 %v763_v23, %v1268_v30  ;;  %v766_v32 = vadd.f32 %v762_v27, %v1266_v26 }
 0x2a7   : > { %809 = vmatprep.subr.mxu1 %v769_v28 }
 0x2a8   : > { %810 = vmatpush1.msra.mxu1 %v768_v29 }
 0x2a9   : > { %811 = vmatprep.subr.mxu1 %v767_v31 }
 0x2aa   : > { %812 = vmatpush1.msra.mxu1 %v766_v32 }
 0x2ab   : > { %939 = vmatmul.mubr.msk.f32.vlgmr.msra.gmra.mxu1 %vm777_vm1, %v770_v33 }
 0x36b   : > { %v847_v36 = vpop.f32.mrf.mxu1 }
 0x36c   : > { %v848_v35 = vadd.f32 %v847_v36, %v775_v34 }
 0x36d   : > { %v849_v37 = vpop.f32.mrf.mxu1 }
 0x36e   : > { %v852_v26 = vadd.f32 %v848_v35, %v1220_v4  ;;  %v850_v30 = vadd.f32 %v849_v37, %v775_v34 }
 0x370   : > { %854 = vst [vmem:[%s379_s13] sm:$0xff] %v852_v26  ;;  %v853_v38 = vadd.f32 %v850_v30, %v1223_v5 }
 0x372   : > { %855 = vst [vmem:[%s379_s13 + $0x8] sm:$0xff] %v853_v38 }
 0x373   : > { %1040 = shalt.err (!%p1037_p3)
}
 0x374   : > { %s1041_s1 = scalar_lea.hbm %s869_s16, 256  ;;  %s1045_s13 = scalar_lea.hbm %s1355_s11, 512 }
 0x375   : > { %p1042_p4 = scmp.ne.s32.totalorder %s869_s16, %s1041_s1  ;;  %p1046_p9 = scmp.lt.s32.totalorder %s869_s16, %s1355_s11 }
 0x376   : > { %p1047_p10 = scmp.lt.s32.totalorder %s1045_s13, %s1041_s1 }
 0x377   : > { %p1043_p7 = pnand %p1042_p4, %p1202_p5 }
 0x378   : > { %p1048_p11 = por %p1047_p10, %p1046_p9 }
 0x379   : > { %p1044_p8 = pneg %p1043_p7 }
 0x37b   : > { %p1049_p12 = pnand %p1048_p11, %p1044_p8 }
 0x37d   : > { %1052 = shalt.err (!%p1049_p12)
}
 0x37e   : > { %947 = dma.vmem_to_hbm [thread:$0]  (%p1202_p5), %s872_s30, 256, %s869_s16, %s857_s22  }
 0x37f PF: > { %p953_p13 = scmp.ge.s32.totalorder %s1087_s20, 2  ;;  %s883_s0 = sand.u32 1, %s1075_s17  }
 0x380   : > { %s884_s24 = scalar_lea.sflag [#allocation3], %s883_s0 }
 0x381   : > { %p950_p0 = pnand %p953_p13, %p1206_p6 }
 0x383   : > { %p951_p1 = pneg %p950_p0 }
 0x385   : > { %1070 = dma.done.wait (%p951_p1), %s884_s24, 256  }
 0x386   : > { %1072 = vsyncadd (%p951_p1), %s884_s24, 4294967040  ;;  %p21_p2 = scmp.ge.s32.totalorder %s1189_s23, 4   ;;  %s1362_s17 = smov %s1079_s18 }
 0x387   : > { %s1363_s18 = smov %s1083_s19  ;;  %s1364_s19 = smov %s1200_s26 }
 0x388   : > { %s1365_s20 = smov %s1189_s23  ;;  %23 = sbr.rel (!%p21_p2) target bundleno = 6 (0x6), region = 99 }
 0x38d   :  { %889 = vsyncpa [#allocation3], 1 }
 0x38e   :  { %891 = vsyncpa [#allocation3 + $0x1], 1 }

</bundles_post_ra>
